<compile_context>
chip_gen: v7x
topology: tpu7x:2x2x1
jax: 0.10.0
libtpu: 0.0.40
codegen_flags: <defaults>
</compile_context>

<pallas_src>
import functools

import jax
import jax.numpy as jnp
from jax.experimental import pallas as pl
from jax.experimental.pallas import tpu as pltpu


def _round_up(x, m):
    return (x + m - 1) // m * m


# ----------------------------------------------------------------------------
# Glue: dense normalized adjacency (GCNConv, improved=True, add_self_loops).
# Built directly at padded size so the kernel's bf16 operand needs no extra
# pad/copy pass.  A depends only on the graph -> hoist out of any time loop.
# ----------------------------------------------------------------------------
def gcn_norm_dense(edge_index, edge_weight, num_nodes, *, n_pad=None,
                   improved=True, dtype=jnp.float32):
    """A_hat[dst, src] = d^-1/2[src] * w * d^-1/2[dst], self-loop weight 2."""
    if n_pad is None:
        n_pad = num_nodes
    fill = 2.0 if improved else 1.0
    src = edge_index[0]
    dst = edge_index[1]
    if edge_weight is None:
        edge_weight = jnp.ones((src.shape[0],), dtype=dtype)
    loop = jnp.arange(num_nodes, dtype=src.dtype)
    src = jnp.concatenate([src, loop])
    dst = jnp.concatenate([dst, loop])
    w = jnp.concatenate([edge_weight.astype(dtype),
                         jnp.full((num_nodes,), fill, dtype=dtype)])
    deg = jnp.zeros((num_nodes,), dtype=dtype).at[dst].add(w)
    dis = jnp.where(deg > 0, 1.0 / jnp.sqrt(deg), 0.0)
    norm = dis[src] * w * dis[dst]
    a = jnp.zeros((n_pad, n_pad), dtype=dtype).at[dst, src].add(norm)
    return a
    # TODO(synk): for very large sparse graphs, replace the dense A_hat with a
    # blocked/sparse propagation (scalar-prefetch block mask).


# ----------------------------------------------------------------------------
# Tile selection
# ----------------------------------------------------------------------------
def _choose_tiles(n):
    """Return (n_pad, tm, tk).  Row axis is the 'parallel' grid dim."""
    n_pad = _round_up(n, 128)
    if n_pad <= 128:
        return n_pad, n_pad, n_pad            # grid (1, 1): nothing to split
    if n_pad < 2048:
        # Two row tiles so both v7x TensorCores get work; full-K reduction.
        n_pad = _round_up(n, 256)
        return n_pad, n_pad // 2, n_pad
    # Large N: 512x1024 bf16 A tiles (1 MiB, 2 MiB double-buffered) hit ~85%+
    # of HBM roofline while fitting the scoped-VMEM budget on all chips.
    n_pad = _round_up(n, 1024)
    return n_pad, 512, 1024


# ----------------------------------------------------------------------------
# Pallas kernel
# ----------------------------------------------------------------------------
def _ggru_kernel(a_ref, x_ref, s_ref, w_ref, b_ref, out_ref, acc_ref,
                 *, tk, ds_pad):
    k = pl.program_id(1)

    @pl.when(k == 0)
    def _():
        acc_ref[...] = jnp.zeros_like(acc_ref)

    # Fused graph propagation: acc += A_tile @ X_rows  (bf16 operands, f32 acc).
    # X is fully VMEM-resident; slice the k-th row stripe in place.
    row0 = pl.multiple_of(k * tk, 128)
    x_rows = x_ref[pl.ds(row0, tk), :]
    acc_ref[...] += jnp.dot(a_ref[...], x_rows,
                            preferred_element_type=jnp.float32)

    @pl.when(k == pl.num_programs(1) - 1)
    def _():
        # Single bf16 cast of the accumulator; ONE stacked gate matmul.
        ax = acc_ref[...].astype(jnp.bfloat16)
        g = jnp.dot(ax, w_ref[...],
                    preferred_element_type=jnp.float32) + b_ref[...]
        # Stacked columns: [reset(pre-summed) | update(pre-summed) | cand_i | cand_s]
        r = jax.nn.sigmoid(g[:, :ds_pad])
        u = jax.nn.sigmoid(g[:, ds_pad:2 * ds_pad])
        c = jnp.tanh(g[:, 2 * ds_pad:3 * ds_pad] + r * g[:, 3 * ds_pad:])
        out_ref[...] = ((1.0 - u) * c + u * s_ref[...]).astype(out_ref.dtype)


# ----------------------------------------------------------------------------
# Wrapper (mirrors GGRU.forward(z, edge_index, s, edge_weight))
# ----------------------------------------------------------------------------
def ggru_forward(z, edge_index, s, params, edge_weight=None):
    """params: Wi_/Ws_ weights [Din, Ds] and bi_/bs_ biases [1, Ds] (f32)."""
    n, ds = s.shape
    dz = z.shape[1]
    dx = dz + ds
    ds_pad = _round_up(ds, 128)
    dx_pad = _round_up(dx, 128)          # z|s packed into one block if dx <= 128
    gw = 4 * ds_pad                      # [reset | update | cand_i | cand_s]

    n_pad, tm, tk = _choose_tiles(n)

    f32 = jnp.float32
    bf16 = jnp.bfloat16

    # Normalized adjacency, built padded, cast once to bf16 (MXU operand).
    a = gcn_norm_dense(edge_index, edge_weight, n, n_pad=n_pad,
                       improved=True).astype(bf16)
    # TODO(synk): quantize A to int8 on v5e/v6e (fp8 e4m3 on v7x) to halve the
    # dominant A HBM traffic; keep X bf16 and f32 accumulation.

    # X = [z | s] packed into dx_pad lanes.
    x = (jnp.zeros((n_pad, dx_pad), bf16)
         .at[:n, :dz].set(z.astype(bf16))
         .at[:n, dz:dx].set(s.astype(bf16)))
    s_pad = jnp.zeros((n_pad, ds_pad), f32).at[:n, :ds].set(s)

    # Stacked gate weights over the full K = dx_pad:
    #   rows [0:dz)   = "z" rows,  rows [dz:dx) = "s" rows
    #   cols [0:ds)            <- Wi_reset + Ws_reset   (r pre-summed)
    #   cols [ds_pad:+ds)      <- Wi_update + Ws_update (u pre-summed)
    #   cols [2*ds_pad:+ds)    <- Wi_cand  (z rows only)
    #   cols [3*ds_pad:+ds)    <- Ws_cand  (s rows only)
    w = jnp.zeros((dx_pad, gw), f32)
    b = jnp.zeros((1, gw), f32)
    w = (w.at[:dz, 0:ds].set(params["Wi_reset"])
          .at[dz:dx, 0:ds].set(params["Ws_reset"])
          .at[:dz, ds_pad:ds_pad + ds].set(params["Wi_update"])
          .at[dz:dx, ds_pad:ds_pad + ds].set(params["Ws_update"])
          .at[:dz, 2 * ds_pad:2 * ds_pad + ds].set(params["Wi_cand"])
          .at[dz:dx, 3 * ds_pad:3 * ds_pad + ds].set(params["Ws_cand"]))
    b = (b.at[:, 0:ds].set(params["bi_reset"] + params["bs_reset"])
          .at[:, ds_pad:ds_pad + ds].set(params["bi_update"] + params["bs_update"])
          .at[:, 2 * ds_pad:2 * ds_pad + ds].set(params["bi_cand"])
          .at[:, 3 * ds_pad:3 * ds_pad + ds].set(params["bs_cand"]))
    w = w.astype(bf16)

    grid = (n_pad // tm, n_pad // tk)
    kernel = functools.partial(_ggru_kernel, tk=tk, ds_pad=ds_pad)

    # Honest cost estimate (X resident -> read once; s/out once per row).
    flops = 2 * n_pad * n_pad * dx_pad + 2 * n_pad * dx_pad * gw
    transcendentals = 3 * n_pad * ds_pad
    bytes_accessed = (2 * n_pad * n_pad          # A (bf16), read once
                      + 2 * n_pad * dx_pad       # X (bf16), resident
                      + 4 * n_pad * ds_pad       # s  (f32) in
                      + 4 * n_pad * ds_pad       # out (f32)
                      + 2 * dx_pad * gw          # stacked W (bf16)
                      + 4 * gw)                  # stacked bias (f32)

    # Scoped-VMEM budget computed from the actual tile set (double-buffered
    # inputs/outputs + f32 accumulator) with headroom, clamped to 64 MiB (v7x).
    buf_bytes = (tm * tk * 2            # A tile
                 + n_pad * dx_pad * 2   # X (resident)
                 + tm * ds_pad * 4      # s tile
                 + dx_pad * gw * 2      # stacked W
                 + 8 * gw * 4           # bias (sublane-padded)
                 + tm * ds_pad * 4)     # out tile
    vmem_limit = int(min(max(2 * buf_bytes + tm * dx_pad * 4 + (2 << 20),
                             16 << 20), 64 << 20))

    out_pad = pl.pallas_call(
        kernel,
        out_shape=jax.ShapeDtypeStruct((n_pad, ds_pad), f32),
        grid_spec=pltpu.PrefetchScalarGridSpec(
            num_scalar_prefetch=0,
            grid=grid,
            in_specs=[
                pl.BlockSpec((tm, tk), lambda i, k: (i, k)),        # A tile
                pl.BlockSpec((n_pad, dx_pad), lambda i, k: (0, 0)), # X resident
                pl.BlockSpec((tm, ds_pad), lambda i, k: (i, 0)),    # s rows
                pl.BlockSpec((dx_pad, gw), lambda i, k: (0, 0)),    # stacked W
                pl.BlockSpec((1, gw), lambda i, k: (0, 0)),         # stacked b
            ],
            out_specs=pl.BlockSpec((tm, ds_pad), lambda i, k: (i, 0)),
            scratch_shapes=[pltpu.VMEM((tm, dx_pad), jnp.float32)],
        ),
        compiler_params=pltpu.CompilerParams(
            dimension_semantics=("parallel", "arbitrary"),
            vmem_limit_bytes=vmem_limit,
        ),
        cost_estimate=pl.CostEstimate(
            flops=int(flops),
            transcendentals=int(transcendentals),
            bytes_accessed=int(bytes_accessed)),
    )(a, x, s_pad, w, b)

    return out_pad[:n, :ds]


# ----------------------------------------------------------------------------
# Pure-JAX f32 reference (original GCNConv ordering: A @ (X W) + b)
# ----------------------------------------------------------------------------
def ggru_reference(a_hat, z, s, p):
    def gcn(x, w, b):
        return a_hat @ (x @ w) + b
    r = jax.nn.sigmoid(gcn(z, p["Wi_reset"], p["bi_reset"])
                       + gcn(s, p["Ws_reset"], p["bs_reset"]))
    u = jax.nn.sigmoid(gcn(z, p["Wi_update"], p["bi_update"])
                       + gcn(s, p["Ws_update"], p["bs_update"]))
    c = jnp.tanh(gcn(z, p["Wi_cand"], p["bi_cand"])
                 + r * gcn(s, p["Ws_cand"], p["bs_cand"]))
    return (1.0 - u) * c + u * s


if __name__ == "__main__":
    # Small synthetic problem: 16 nodes, struct_embed_dim=8, state_dim=32.
    N, DZ, DS = 16, 8, 32
    key = jax.random.PRNGKey(0)
    keys = jax.random.split(key, 16)

    z = jax.random.normal(keys[0], (N, DZ), dtype=jnp.float32)
    s = jax.random.normal(keys[1], (N, DS), dtype=jnp.float32)

    # Ring graph, both directions, unit edge weights.
    src = jnp.arange(N, dtype=jnp.int32)
    dst = (src + 1) % N
    edge_index = jnp.stack([jnp.concatenate([src, dst]),
                            jnp.concatenate([dst, src])], axis=0)   # [2, 2N]
    edge_weight = jnp.ones((2 * N,), dtype=jnp.float32)

    def init_w(k, din, dout):
        scale = 1.0 / jnp.sqrt(jnp.float32(din))
        return (jax.random.uniform(k, (din, dout), dtype=jnp.float32) * 2 - 1) * scale

    params = {
        "Wi_reset":  init_w(keys[2], DZ, DS),
        "Ws_reset":  init_w(keys[3], DS, DS),
        "Wi_update": init_w(keys[4], DZ, DS),
        "Ws_update": init_w(keys[5], DS, DS),
        "Wi_cand":   init_w(keys[6], DZ, DS),
        "Ws_cand":   init_w(keys[7], DS, DS),
        "bi_reset":  0.01 * jax.random.normal(keys[8],  (1, DS), dtype=jnp.float32),
        "bs_reset":  0.01 * jax.random.normal(keys[9],  (1, DS), dtype=jnp.float32),
        "bi_update": 0.01 * jax.random.normal(keys[10], (1, DS), dtype=jnp.float32),
        "bs_update": 0.01 * jax.random.normal(keys[11], (1, DS), dtype=jnp.float32),
        "bi_cand":   0.01 * jax.random.normal(keys[12], (1, DS), dtype=jnp.float32),
        "bs_cand":   0.01 * jax.random.normal(keys[13], (1, DS), dtype=jnp.float32),
    }

    out = ggru_forward(z, edge_index, s, params, edge_weight)
    out = jax.block_until_ready(out)

    a_hat = gcn_norm_dense(edge_index, edge_weight, N, improved=True)
    ref = ggru_reference(a_hat, z, s, params)
    assert out.shape == (N, DS)
    # bf16 MXU operands with f32 accumulation -> loosen tolerance vs f32 ref.
    assert jnp.allclose(out, ref, atol=5e-2, rtol=5e-2)

    print("KERNEL_OK")
</pallas_src>

<mosaic_0001>
module attributes {stable_mosaic.version = 11 : i64} {
  func.func @_ggru_kernel(%arg0: i32, %arg1: i32, %arg2: memref<128x128xbf16, #tpu.memory_space<vmem>>, %arg3: memref<128x128xbf16, #tpu.memory_space<vmem>>, %arg4: memref<128x128xf32, #tpu.memory_space<vmem>>, %arg5: memref<128x512xbf16, #tpu.memory_space<vmem>>, %arg6: memref<1x512xf32, #tpu.memory_space<vmem>>, %arg7: memref<128x128xf32, #tpu.memory_space<vmem>>, %arg8: memref<128x128xf32, #tpu.memory_space<vmem>>) attributes {dimension_semantics = [#tpu.dimension_semantics<parallel>, #tpu.dimension_semantics<arbitrary>], iteration_bounds = array<i64: 1, 1>, scalar_prefetch = 0 : i64, scratch_operands = 1 : i64, tpu.core_type = #tpu.core_type<tc>, window_params = [{transform_indices = @transform_0, window_bounds = array<i64: 128, 128>}, {pipeline_mode = #tpu.pipeline_mode<synchronous>, transform_indices = @transform_1, window_bounds = array<i64: 128, 128>}, {transform_indices = @transform_2, window_bounds = array<i64: 128, 128>}, {pipeline_mode = #tpu.pipeline_mode<synchronous>, transform_indices = @transform_3, window_bounds = array<i64: 128, 512>}, {pipeline_mode = #tpu.pipeline_mode<synchronous>, transform_indices = @transform_4, window_bounds = array<i64: 1, 512>}, {transform_indices = @transform_5, window_bounds = array<i64: 128, 128>}]} {
    %c0_i32 = arith.constant 0 : i32
    %0 = arith.cmpi eq, %arg1, %c0_i32 : i32
    %1 = arith.extui %0 : i1 to i32
    %c0_i32_0 = arith.constant 0 : i32
    %2 = arith.cmpi ne, %1, %c0_i32_0 : i32
    scf.if %2 {
      %cst_9 = arith.constant 0.000000e+00 : f32
      %15 = vector.broadcast %cst_9 : f32 to vector<128x128xf32>
      %c0_10 = arith.constant 0 : index
      %c0_11 = arith.constant 0 : index
      %16 = vector.load %arg8[%c0_10, %c0_11] : memref<128x128xf32, #tpu.memory_space<vmem>>, vector<128x128xf32>
      tpu.vector_store %arg8[%c0_10, %c0_11], %15 {strides = array<i32>} : memref<128x128xf32, #tpu.memory_space<vmem>>, vector<128x128xf32>,
    } else {
    }
    %c128_i32 = arith.constant 128 : i32
    %3 = arith.muli %arg1, %c128_i32 : i32
    %4 = tpu.assume_multiple %3, 128 : i32
    %5 = arith.index_cast %4 : i32 to index
    %c0 = arith.constant 0 : index
    %6 = vector.load %arg3[%5, %c0] : memref<128x128xbf16, #tpu.memory_space<vmem>>, vector<128x128xbf16>
    %c0_1 = arith.constant 0 : index
    %c0_2 = arith.constant 0 : index
    %7 = vector.load %arg8[%c0_1, %c0_2] : memref<128x128xf32, #tpu.memory_space<vmem>>, vector<128x128xf32>
    %c0_3 = arith.constant 0 : index
    %c0_4 = arith.constant 0 : index
    %8 = vector.load %arg2[%c0_3, %c0_4] : memref<128x128xbf16, #tpu.memory_space<vmem>>, vector<128x128xbf16>
    %cst = arith.constant dense<0.000000e+00> : vector<128x128xf32>
    %9 = tpu.matmul %8, %6, %cst {dimension_numbers = #tpu.dot_dimension_numbers<[1], [0], [0], [1], [0, 0, 1, 1], [], []>} : vector<128x128xbf16>, vector<128x128xbf16>, vector<128x128xf32> -> vector<128x128xf32>
    %10 = arith.addf %7, %9 : vector<128x128xf32>
    %c0_5 = arith.constant 0 : index
    %c0_6 = arith.constant 0 : index
    %11 = vector.load %arg8[%c0_5, %c0_6] : memref<128x128xf32, #tpu.memory_space<vmem>>, vector<128x128xf32>
    tpu.vector_store %arg8[%c0_5, %c0_6], %10 {strides = array<i32>} : memref<128x128xf32, #tpu.memory_space<vmem>>, vector<128x128xf32>,
    %c0_i32_7 = arith.constant 0 : i32
    %12 = arith.cmpi eq, %arg1, %c0_i32_7 : i32
    %13 = arith.extui %12 : i1 to i32
    %c0_i32_8 = arith.constant 0 : i32
    %14 = arith.cmpi ne, %13, %c0_i32_8 : i32
    scf.if %14 {
      %c0_9 = arith.constant 0 : index
      %c0_10 = arith.constant 0 : index
      %15 = vector.load %arg8[%c0_9, %c0_10] : memref<128x128xf32, #tpu.memory_space<vmem>>, vector<128x128xf32>
      %16 = arith.truncf %15 : vector<128x128xf32> to vector<128x128xbf16>
      %c0_11 = arith.constant 0 : index
      %c0_12 = arith.constant 0 : index
      %17 = vector.load %arg5[%c0_11, %c0_12] : memref<128x512xbf16, #tpu.memory_space<vmem>>, vector<128x512xbf16>
      %cst_13 = arith.constant dense<0.000000e+00> : vector<128x512xf32>
      %18 = tpu.matmul %16, %17, %cst_13 {dimension_numbers = #tpu.dot_dimension_numbers<[1], [0], [0], [1], [0, 0, 1, 1], [], []>} : vector<128x128xbf16>, vector<128x512xbf16>, vector<128x512xf32> -> vector<128x512xf32>
      %c0_14 = arith.constant 0 : index
      %c0_15 = arith.constant 0 : index
      %19 = vector.load %arg6[%c0_14, %c0_15] : memref<1x512xf32, #tpu.memory_space<vmem>>, vector<1x512xf32>
      %20 = vector.broadcast %19 : vector<1x512xf32> to vector<128x512xf32>
      %21 = arith.addf %18, %20 : vector<128x512xf32>
      %22 = vector.extract_strided_slice %21 {offsets = [0, 0], sizes = [128, 128], strides = [1, 1]} : vector<128x512xf32> to vector<128x128xf32>
      %23 = arith.negf %22 : vector<128x128xf32>
      %24 = math.exp %23 : vector<128x128xf32>
      %cst_16 = arith.constant 1.000000e+00 : f32
      %25 = vector.broadcast %cst_16 : f32 to vector<128x128xf32>
      %26 = arith.addf %25, %24 : vector<128x128xf32>
      %27 = arith.divf %25, %26 : vector<128x128xf32>
      %28 = vector.extract_strided_slice %21 {offsets = [0, 128], sizes = [128, 128], strides = [1, 1]} : vector<128x512xf32> to vector<128x128xf32>
      %29 = arith.negf %28 : vector<128x128xf32>
      %30 = math.exp %29 : vector<128x128xf32>
      %cst_17 = arith.constant 1.000000e+00 : f32
      %31 = vector.broadcast %cst_17 : f32 to vector<128x128xf32>
      %32 = arith.addf %31, %30 : vector<128x128xf32>
      %33 = arith.divf %31, %32 : vector<128x128xf32>
      %34 = vector.extract_strided_slice %21 {offsets = [0, 256], sizes = [128, 128], strides = [1, 1]} : vector<128x512xf32> to vector<128x128xf32>
      %35 = vector.extract_strided_slice %21 {offsets = [0, 384], sizes = [128, 128], strides = [1, 1]} : vector<128x512xf32> to vector<128x128xf32>
      %36 = arith.mulf %27, %35 : vector<128x128xf32>
      %37 = arith.addf %34, %36 : vector<128x128xf32>
      %38 = math.tanh %37 : vector<128x128xf32>
      %cst_18 = arith.constant 1.000000e+00 : f32
      %39 = vector.broadcast %cst_18 : f32 to vector<128x128xf32>
      %40 = arith.subf %39, %33 : vector<128x128xf32>
      %41 = arith.mulf %40, %38 : vector<128x128xf32>
      %c0_19 = arith.constant 0 : index
      %c0_20 = arith.constant 0 : index
      %42 = vector.load %arg4[%c0_19, %c0_20] : memref<128x128xf32, #tpu.memory_space<vmem>>, vector<128x128xf32>
      %43 = arith.mulf %33, %42 : vector<128x128xf32>
      %44 = arith.addf %41, %43 : vector<128x128xf32>
      %c0_21 = arith.constant 0 : index
      %c0_22 = arith.constant 0 : index
      %45 = vector.load %arg7[%c0_21, %c0_22] : memref<128x128xf32, #tpu.memory_space<vmem>>, vector<128x128xf32>
      tpu.vector_store %arg7[%c0_21, %c0_22], %44 {strides = array<i32>} : memref<128x128xf32, #tpu.memory_space<vmem>>, vector<128x128xf32>,
    } else {
    }
    return
  }
  func.func @transform_0(%arg0: i32, %arg1: i32) -> (i32, i32) {
    %c0_i32 = arith.constant 0 : i32
    return %arg0, %arg1 : i32, i32
  }
  func.func @transform_1(%arg0: i32, %arg1: i32) -> (i32, i32) {
    %c0_i32 = arith.constant 0 : i32
    %c0_i32_0 = arith.constant 0 : i32
    %c0_i32_1 = arith.constant 0 : i32
    return %c0_i32, %c0_i32_0 : i32, i32
  }
  func.func @transform_2(%arg0: i32, %arg1: i32) -> (i32, i32) {
    %c0_i32 = arith.constant 0 : i32
    %c0_i32_0 = arith.constant 0 : i32
    return %arg0, %c0_i32 : i32, i32
  }
  func.func @transform_3(%arg0: i32, %arg1: i32) -> (i32, i32) {
    %c0_i32 = arith.constant 0 : i32
    %c0_i32_0 = arith.constant 0 : i32
    %c0_i32_1 = arith.constant 0 : i32
    return %c0_i32, %c0_i32_0 : i32, i32
  }
  func.func @transform_4(%arg0: i32, %arg1: i32) -> (i32, i32) {
    %c0_i32 = arith.constant 0 : i32
    %c0_i32_0 = arith.constant 0 : i32
    %c0_i32_1 = arith.constant 0 : i32
    return %c0_i32, %c0_i32_0 : i32, i32
  }
  func.func @transform_5(%arg0: i32, %arg1: i32) -> (i32, i32) {
    %c0_i32 = arith.constant 0 : i32
    %c0_i32_0 = arith.constant 0 : i32
    return %arg0, %c0_i32 : i32, i32
  }
}

</mosaic_0001>

<bundles_post_ra>
// kernel: tpu_custom_call.1
= control target key start
LH: loop header
LB: loop body
LE: loop exit
PB: predicated region body
PF: predicated region fallthrough
CT: control target
= control target key end

     0   :  { %10 = vsyncpa [#allocation4], 0  ;;  %s2092_s0 = inlined_call_operand.hbm [shape: bf16[128,128], index: 0, kind: input, shape index: {}]   ;;  %s2093_s1 = inlined_call_operand.hbm [shape: bf16[128,128], index: 1, kind: input, shape index: {}]   ;;  %s2094_s2 = inlined_call_operand.hbm [shape: f32[128,128], index: 2, kind: input, shape index: {}]   ;;  %s2095_s3 = inlined_call_operand.hbm [shape: bf16[128,512], index: 3, kind: input, shape index: {}]   ;;  %s2096_s4 = inlined_call_operand.vmem [shape: f32[1,512], index: 4, kind: input, shape index: {}]   ;;  %s2097_s5 = inlined_call_operand.hbm [shape: f32[128,128], index: 5, kind: output, shape index: {}]  }
   0x1   :  { %11 = vsyncpa [#allocation7], 0 }
   0x2   :  { %12 = vsyncpa [#allocation10], 0 }
   0x3   :  { %13 = vsyncpa [#allocation5], 0  ;;  %s1697_s18 = smov [#allocation6]   ;;  %s1698_s20 = smov [#allocation3]  }
   0x4   :  { %s31_s19 = sshll.u32 %s1697_s18, 4  ;;  %s19_s21 = sshll.u32 %s1698_s20, 4  ;;  %s32_s19 = int_to_ptr.vmem [resolvable:$true] %s31_s19  ;;  %s1739_s21 = int_to_ptr.vmem [resolvable:$true] %s19_s21 }
   0x5   :  { %s1579_s24 = scalar_lea.hbm %s2093_s1, 1024 }
   0x6   :  { %p1580_p0 = scmp.ne.s32.totalorder %s2093_s1, %s1579_s24  ;;  %p1583_p1 = scmp.lt.u32.totalorder %s1579_s24, %s2093_s1 }
   0x8   :  { %p1585_p2 = pnand %p1583_p1, %p1580_p0 }
   0xa   :  { %1588 = shalt.err (!%p1585_p2)
}
   0xb   :  { %s1589_s29 = scalar_lea.vmem %s32_s19, 1024  ;;  %p1594_p4 = scmp.lt.s32.totalorder %s32_s19, %s32_s19 }
   0xc   :  { %p1590_p3 = scmp.ne.s32.totalorder %s32_s19, %s1589_s29  ;;  %p1595_p5 = scmp.lt.s32.totalorder %s1589_s29, %s1589_s29 }
   0xe   :  { %p1596_p6 = por %p1595_p5, %p1594_p4 }
  0x10   :  { %p1597_p7 = pnand %p1596_p6, %p1590_p3 }
  0x12   :  { %1600 = shalt.err (!%p1597_p7)
}
  0x13   :  { %s1699_s30 = smov 64   ;;  %s1700_s6 = smov 4  }
  0x14   :  { %37 = dma.hbm_to_vmem [thread:$0]  %s2093_s1, 1024, %s32_s19, [#allocation7], %s1699_s30, %s1699_s30, %s1700_s6  }
  0x15   :  { %s1601_s11 = scalar_lea.hbm %s2092_s0, 1024 }
  0x16   :  { %p1602_p8 = scmp.ne.s32.totalorder %s2092_s0, %s1601_s11  ;;  %p1605_p9 = scmp.lt.u32.totalorder %s1601_s11, %s2092_s0 }
  0x18   :  { %p1607_p10 = pnand %p1605_p9, %p1602_p8 }
  0x1a   :  { %1610 = shalt.err (!%p1607_p10)
}
  0x1b   :  { %s1611_s16 = scalar_lea.vmem %s1739_s21, 1024  ;;  %p1616_p12 = scmp.lt.s32.totalorder %s1739_s21, %s1739_s21 }
  0x1c   :  { %p1612_p11 = scmp.ne.s32.totalorder %s1739_s21, %s1611_s16  ;;  %p1617_p13 = scmp.lt.s32.totalorder %s1611_s16, %s1611_s16 }
  0x1e   :  { %p1618_p0 = por %p1617_p13, %p1616_p12 }
  0x20   :  { %p1619_p1 = pnand %p1618_p0, %p1612_p11 }
  0x22   :  { %1622 = shalt.err (!%p1619_p1)
}
  0x23   :  { %25 = dma.hbm_to_vmem [thread:$0]  %s2092_s0, 1024, %s1739_s21, [#allocation4], %s1699_s30, %s1699_s30, %s1700_s6  }
  0x24   :  { %s1701_s18 = smov [#allocation8]   ;;  %s1623_s23 = scalar_lea.hbm %s2094_s2, 2048 }
  0x25   :  { %s43_s19 = sshll.u32 %s1701_s18, 4  ;;  %p1624_p2 = scmp.ne.s32.totalorder %s2094_s2, %s1623_s23  ;;  %s44_s19 = int_to_ptr.vmem [resolvable:$true] %s43_s19 }
  0x26   :  { %p1627_p3 = scmp.lt.u32.totalorder %s1623_s23, %s2094_s2 }
  0x28   :  { %p1629_p4 = pnand %p1627_p3, %p1624_p2 }
  0x2a   :  { %1632 = shalt.err (!%p1629_p4)
}
  0x2b   :  { %s1633_s28 = scalar_lea.vmem %s44_s19, 2048  ;;  %p1638_p6 = scmp.lt.s32.totalorder %s44_s19, %s44_s19 }
  0x2c   :  { %p1634_p5 = scmp.ne.s32.totalorder %s44_s19, %s1633_s28  ;;  %p1639_p7 = scmp.lt.s32.totalorder %s1633_s28, %s1633_s28 }
  0x2e   :  { %p1640_p8 = por %p1639_p7, %p1638_p6 }
  0x30   :  { %p1641_p9 = pnand %p1640_p8, %p1634_p5 }
  0x32   :  { %1644 = shalt.err (!%p1641_p9)
}
  0x33   :  { %s1702_s0 = smov 128   ;;  %s1703_s21 = smov 8  }
  0x34   :  { %49 = dma.hbm_to_vmem [thread:$0]  %s2094_s2, 2048, %s44_s19, [#allocation7], %s1702_s0, %s1702_s0, %s1703_s21  }
  0x35   :  { %s1704_s6 = smov [#allocation9]   ;;  %s1645_s10 = scalar_lea.hbm %s2095_s3, 4096 }
  0x36   :  { %s55_s7 = sshll.u32 %s1704_s6, 4  ;;  %p1646_p10 = scmp.ne.s32.totalorder %s2095_s3, %s1645_s10  ;;  %s56_s7 = int_to_ptr.vmem [resolvable:$true] %s55_s7 }
  0x37   :  { %p1649_p11 = scmp.lt.u32.totalorder %s1645_s10, %s2095_s3 }
  0x39   :  { %p1651_p12 = pnand %p1649_p11, %p1646_p10 }
  0x3b   :  { %1654 = shalt.err (!%p1651_p12)
}
  0x3c   :  { %s1655_s15 = scalar_lea.vmem %s56_s7, 4096  ;;  %p1660_p0 = scmp.lt.s32.totalorder %s56_s7, %s56_s7 }
  0x3d   :  { %p1656_p13 = scmp.ne.s32.totalorder %s56_s7, %s1655_s15  ;;  %p1661_p1 = scmp.lt.s32.totalorder %s1655_s15, %s1655_s15 }
  0x3f   :  { %p1662_p2 = por %p1661_p1, %p1660_p0 }
  0x41   :  { %p1663_p3 = pnand %p1662_p2, %p1656_p13 }
  0x43   :  { %1666 = shalt.err (!%p1663_p3)
}
  0x44   :  { %s1705_s2 = smov 256   ;;  %s1706_s16 = smov 16  }
  0x45   :  { %61 = dma.hbm_to_vmem [thread:$0]  %s2095_s3, 4096, %s56_s7, [#allocation10], %s1705_s2, %s1705_s2, %s1706_s16  }
  0x46   :  { %1689 = dma.done.wait [#allocation4], 1024  }
  0x47   :  { %1690 = vsyncadd [#allocation4], 4294966272 }
  0x48   :  { %1691 = dma.done.wait [#allocation7], 3072  }
  0x49   :  { %1692 = vsyncadd [#allocation7], 4294964224 }
  0x4a   :  { %1693 = dma.done.wait [#allocation10], 4096  }
  0x4b   :  { %1694 = vsyncadd [#allocation10], 4294963200  ;;  %v1355_v0 = vld [vmem:[#allocation6] sm:$0xff]   ;;  %v1356_v1 = vld [vmem:[#allocation6 + $0x8] sm:$0xff]   ;;  %v1707_v48 = vmov 0  }
  0x4c   :  { %1295 = vmatprep.subr.bf16.mxu0 %v1355_v0  ;;  %v1357_v2 = vld [vmem:[#allocation6 + $0x10] sm:$0xff]   ;;  %v1358_v3 = vld [vmem:[#allocation6 + $0x18] sm:$0xff]   ;;  %v1363_v4 = vld [vmem:[#allocation3] sm:$0xff]   ;;  %648 = vmatprep.mubr.bf16.mxu1 %v1707_v48 }
  0x4d   :  { %1296 = vmatpush3.bf16.msra.mxu0 %v1355_v0  ;;  %1311 = vmatprep.mubr.bf16.mxu0 %v1363_v4  ;;  %v1359_v5 = vld [vmem:[#allocation6 + $0x20] sm:$0xff]   ;;  %v1360_v6 = vld [vmem:[#allocation6 + $0x28] sm:$0xff]   ;;  %v1361_v10 = vld [vmem:[#allocation6 + $0x30] sm:$0xff]  }
  0x4e   :  { %1297 = vmatprep.subr.bf16.mxu0 %v1356_v1  ;;  %v1371_v7 = vld [vmem:[#allocation9 + $0x4] ss:$16 sps:$4 sm:$0xff]   ;;  %v1376_v8 = vld [vmem:[#allocation9] ss:$16 sps:$4 sm:$0xff]   ;;  %v1362_v13 = vld [vmem:[#allocation6 + $0x38] sm:$0xff]  }
  0x4f   :  { %616 = vmatprep.subr.bf16.mxu1 %v1371_v7  ;;  %v1377_v9 = vld [vmem:[#allocation9 + $0x24] ss:$16 sps:$4 sm:$0xff]   ;;  %v1382_v11 = vld [vmem:[#allocation9 + $0x20] ss:$16 sps:$4 sm:$0xff]   ;;  %v1797_v16 = vld [vmem:[#allocation9 + $0xc] ss:$16 sps:$4 sm:$0xff]  }
  0x50   :  { %617 = vmatpush1.bf16.msra.mxu1 %v1376_v8  ;;  %v1383_v12 = vld [vmem:[#allocation9 + $0x44] ss:$16 sps:$4 sm:$0xff]   ;;  %v1388_v14 = vld [vmem:[#allocation9 + $0x40] ss:$16 sps:$4 sm:$0xff]   ;;  %v1364_v19 = vld [vmem:[#allocation3 + $0x8] sm:$0xff]  }
  0x51   :  { %1298 = vmatpush3.bf16.msra.mxu0 %v1356_v1  ;;  %618 = vmatprep.subr.bf16.mxu1 %v1377_v9  ;;  %v1389_v15 = vld [vmem:[#allocation9 + $0x64] ss:$16 sps:$4 sm:$0xff]   ;;  %v1394_v17 = vld [vmem:[#allocation9 + $0x60] ss:$16 sps:$4 sm:$0xff]   ;;  %v1799_v21 = vld [vmem:[#allocation9 + $0x8] ss:$16 sps:$4 sm:$0xff]   ;;  %v436_v9 = vlaneseq }
  0x52   :  { %1299 = vmatprep.subr.bf16.mxu0 %v1357_v2  ;;  %v1395_v18 = vld [vmem:[#allocation9 + $0x84] ss:$16 sps:$4 sm:$0xff]   ;;  %v1801_v22 = vld [vmem:[#allocation9 + $0x2c] ss:$16 sps:$4 sm:$0xff]   ;;  %v1400_v23 = vld [vmem:[#allocation9 + $0x80] ss:$16 sps:$4 sm:$0xff]  }
  0x53   :  { %v1365_v20 = vld [vmem:[#allocation3 + $0x10] sm:$0xff]   ;;  %v1804_v25 = vld [vmem:[#allocation9 + $0x28] ss:$16 sps:$4 sm:$0xff]   ;;  %v1808_v26 = vld [vmem:[#allocation9 + $0x4c] ss:$16 sps:$4 sm:$0xff]  }
  0x54   :  { %619 = vmatpush1.bf16.msra.mxu1 %v1382_v11  ;;  %v1401_v24 = vld [vmem:[#allocation9 + $0xa4] ss:$16 sps:$4 sm:$0xff]   ;;  %v1406_v27 = vld [vmem:[#allocation9 + $0xa0] ss:$16 sps:$4 sm:$0xff]   ;;  %v1366_v29 = vld [vmem:[#allocation3 + $0x18] sm:$0xff]  }
  0x55   :  { %1300 = vmatpush3.bf16.msra.mxu0 %v1357_v2  ;;  %620 = vmatprep.subr.bf16.mxu1 %v1383_v12  ;;  %v1407_v28 = vld [vmem:[#allocation9 + $0xc4] ss:$16 sps:$4 sm:$0xff]   ;;  %v1811_v31 = vld [vmem:[#allocation9 + $0x48] ss:$16 sps:$4 sm:$0xff]   ;;  %v1814_v32 = vld [vmem:[#allocation9 + $0x6c] ss:$16 sps:$4 sm:$0xff]  }
  0x56   :  { %1301 = vmatprep.subr.bf16.mxu0 %v1358_v3  ;;  %v1367_v30 = vld [vmem:[#allocation3 + $0x20] sm:$0xff]   ;;  %v1817_v34 = vld [vmem:[#allocation9 + $0x68] ss:$16 sps:$4 sm:$0xff]   ;;  %v1820_v35 = vld [vmem:[#allocation9 + $0x8c] ss:$16 sps:$4 sm:$0xff]  }
  0x57   :  { %v1412_v33 = vld [vmem:[#allocation9 + $0xc0] ss:$16 sps:$4 sm:$0xff]   ;;  %v1368_v36 = vld [vmem:[#allocation3 + $0x28] sm:$0xff]   ;;  %v1370_v42 = vld [vmem:[#allocation3 + $0x38] sm:$0xff]  }
  0x58   :  { %621 = vmatpush1.bf16.msra.mxu1 %v1388_v14  ;;  %v1369_v37 = vld [vmem:[#allocation3 + $0x30] sm:$0xff]   ;;  %v1823_v38 = vld [vmem:[#allocation9 + $0x88] ss:$16 sps:$4 sm:$0xff]   ;;  %v1826_v39 = vld [vmem:[#allocation9 + $0xac] ss:$16 sps:$4 sm:$0xff]  }
  0x59   :  { %1302 = vmatpush3.bf16.msra.mxu0 %v1358_v3  ;;  %622 = vmatprep.subr.bf16.mxu1 %v1389_v15  ;;  %v1829_v40 = vld [vmem:[#allocation9 + $0xa8] ss:$16 sps:$4 sm:$0xff]   ;;  %v1832_v41 = vld [vmem:[#allocation9 + $0xcc] ss:$16 sps:$4 sm:$0xff]   ;;  %v1413_v44 = vld [vmem:[#allocation9 + $0xe4] ss:$16 sps:$4 sm:$0xff]  }
  0x5a   :  { %1303 = vmatprep.subr.bf16.mxu0 %v1359_v5  ;;  %v1835_v43 = vld [vmem:[#allocation9 + $0xc8] ss:$16 sps:$4 sm:$0xff]   ;;  %v1839_v45 = vld [vmem:[#allocation9 + $0xec] ss:$16 sps:$4 sm:$0xff]   ;;  %v1418_v47 = vld [vmem:[#allocation9 + $0xe0] ss:$16 sps:$4 sm:$0xff]  }
  0x5b   :  { %v1841_v46 = vld [vmem:[#allocation9 + $0xe8] ss:$16 sps:$4 sm:$0xff]   ;;  %v1883_v12 = vld [vmem:[%s2096_s4] sm:$0xf]  ;;  %s1708_s4 = smov [#allocation11]  }
  0x5c   :  { %623 = vmatpush1.bf16.msra.mxu1 %v1394_v17  ;;  %s1183_s19 = sshll.u32 %s1708_s4, 4  ;;  %s1184_s19 = int_to_ptr.vmem [resolvable:$true] %s1183_s19 }
  0x5d   :  { %1304 = vmatpush3.bf16.msra.mxu0 %v1359_v5  ;;  %624 = vmatprep.subr.bf16.mxu1 %v1395_v18  ;;  %s1667_s20 = scalar_lea.vmem %s1184_s19, 2048  ;;  %p1672_p5 = scmp.lt.s32.totalorder %s1184_s19, %s1184_s19 }
  0x5e   :  { %1305 = vmatprep.subr.bf16.mxu0 %v1360_v6  ;;  %p1668_p4 = scmp.ne.s32.totalorder %s1184_s19, %s1667_s20  ;;  %p1673_p6 = scmp.lt.s32.totalorder %s1667_s20, %s1667_s20 }
  0x60   :  { %625 = vmatpush1.bf16.msra.mxu1 %v1400_v23  ;;  %p1674_p7 = por %p1673_p6, %p1672_p5 }
  0x61   :  { %1306 = vmatpush3.bf16.msra.mxu0 %v1360_v6  ;;  %626 = vmatprep.subr.bf16.mxu1 %v1401_v24 }
  0x62   :  { %1307 = vmatprep.subr.bf16.mxu0 %v1361_v10  ;;  %p1675_p8 = pnand %p1674_p7, %p1668_p4 }
  0x64   :  { %627 = vmatpush1.bf16.msra.mxu1 %v1406_v27 }
  0x65   :  { %1308 = vmatpush3.bf16.msra.mxu0 %v1361_v10  ;;  %628 = vmatprep.subr.bf16.mxu1 %v1407_v28  ;;  %v1877_v10 = vshrl.u32 %v436_v9, 7 }
  0x66   :  { %1309 = vmatprep.subr.bf16.mxu0 %v1362_v13 }
  0x67   :  { %v438_v11 = vsub.s32 0, %v1877_v10 }
  0x68   :  { %629 = vmatpush1.bf16.msra.mxu1 %v1412_v33 }
  0x69   :  { %1310 = vmatpush3.bf16.msra.mxu0 %v1362_v13  ;;  %630 = vmatprep.subr.bf16.mxu1 %v1413_v44  ;;  %v442_v13 = vsub.s32 1, %v1877_v10  ;;  %v1887_v14 = vrot.slane %v1883_v12, %v438_v11 }
  0x6a   :  { %729 = vmatprep.subr.bf16.mxu0 %v1797_v16 }
  0x6b   :  { %v1890_v15 = vrot.slane %v1883_v12, %v442_v13 }
  0x6c   :  { %1312 = vmatmul.mubr.bf16.vlgmr.msra.gmra.mrb[0].mxu0 %v1364_v19  ;;  %631 = vmatpush1.bf16.msra.mxu1 %v1418_v47 }
  0x6d   :  { %1315 = vmatprep.mubr.bf16.mxu0 %v1365_v20  ;;  %730 = vmatpush1.bf16.msra.mxu0 %v1799_v21 }
  0x6e   :  { %731 = vmatprep.subr.bf16.mxu0 %v1801_v22  ;;  %1327 = vmatprep.subr.bf16.mxu1 %v1797_v16 }
  0x71   :  { %732 = vmatpush1.bf16.msra.mxu0 %v1804_v25 }
  0x72   :  { %733 = vmatprep.subr.bf16.mxu0 %v1808_v26 }
  0x74   :  { %1316 = vmatmul.mubr.bf16.gmra.mrb[4].mxu0 %v1366_v29 }
  0x75   :  { %1319 = vmatprep.mubr.bf16.mxu0 %v1367_v30  ;;  %734 = vmatpush1.bf16.msra.mxu0 %v1811_v31 }
  0x76   :  { %735 = vmatprep.subr.bf16.mxu0 %v1814_v32 }
  0x79   :  { %736 = vmatpush1.bf16.msra.mxu0 %v1817_v34 }
  0x7a   :  { %737 = vmatprep.subr.bf16.mxu0 %v1820_v35 }
  0x7c   :  { %1320 = vmatmul.mubr.bf16.gmra.mrb[8].mxu0 %v1368_v36 }
  0x7d   :  { %1323 = vmatprep.mubr.bf16.mxu0 %v1369_v37  ;;  %738 = vmatpush1.bf16.msra.mxu0 %v1823_v38 }
  0x7e   :  { %739 = vmatprep.subr.bf16.mxu0 %v1826_v39 }
  0x81   :  { %740 = vmatpush1.bf16.msra.mxu0 %v1829_v40 }
  0x82   :  { %741 = vmatprep.subr.bf16.mxu0 %v1832_v41 }
  0x84   :  { %1324 = vmatmul.mubr.bf16.gmra.mrb[12].mxu0 %v1370_v42 }
  0x85   :  { %742 = vmatpush1.bf16.msra.mxu0 %v1835_v43  ;;  %761 = vmatprep.mubr.bf16.mxu0 %v1707_v48 }
  0x86   :  { %743 = vmatprep.subr.bf16.mxu0 %v1839_v45 }
  0x89   :  { %744 = vmatpush1.bf16.msra.mxu0 %v1841_v46 }
 0x13f   :  { %v1313_v49 = vpop.f32.mrb[0].mxu0 }
 0x140   :  { %v280_v50 = vpop.f32.mrb[1].mxu0 }
 0x141   :  { %v1314_v51 = vpop.f32.mrb[2].mxu0 }
 0x142   :  { %v395_v52 = vpack.c.bf16 %v1314_v51, %v1313_v49  ;;  %v283_v53 = vpop.f32.mrb[3].mxu0 }
 0x143   :  { %v394_v54 = vpack.c.bf16 %v283_v53, %v280_v50 }
 0x145   :  { %649 = vmatmul.mubr.bf16.vlgmr.msra.gmra.mrb[0].mxu1 %v394_v54  ;;  %762 = vmatmul.mubr.bf16.vlgmr.msra.gmra.mrb[16].mxu0 %v394_v54 }
 0x146   :  { %658 = vmatprep.mubr.bf16.mxu1 %v1707_v48  ;;  %771 = vmatprep.mubr.bf16.mxu0 %v1707_v48 }
 0x147   :  { %v1317_v55 = vpop.f32.mrb[4].mxu0  ;;  %1335 = vmatpush1.bf16.msra.mxu1 %v1799_v21 }
 0x148   :  { %v296_v56 = vpop.f32.mrb[5].mxu0  ;;  %1328 = vmatprep.subr.bf16.mxu1 %v1801_v22 }
 0x149   :  { %v1318_v57 = vpop.f32.mrb[6].mxu0 }
 0x14a   :  { %v397_v58 = vpack.c.bf16 %v1318_v57, %v1317_v55  ;;  %v299_v59 = vpop.f32.mrb[7].mxu0  ;;  %v450_v57 = vsub.s32 3, %v1877_v10 }
 0x14b   :  { %v396_v60 = vpack.c.bf16 %v299_v59, %v296_v56  ;;  %1336 = vmatpush1.bf16.msra.mxu1 %v1804_v25 }
 0x14c   :  { %1329 = vmatprep.subr.bf16.mxu1 %v1808_v26  ;;  %v1931_v9 = vrot.slane %v1883_v12, %v450_v57 }
 0x14d   :  { %659 = vmatmul.mubr.bf16.gmra.mrb[4].mxu1 %v395_v52  ;;  %772 = vmatmul.mubr.bf16.gmra.mrb[20].mxu0 %v395_v52 }
 0x14e   :  { %668 = vmatprep.mubr.bf16.mxu1 %v1707_v48  ;;  %781 = vmatprep.mubr.bf16.mxu0 %v1707_v48 }
 0x14f   :  { %v1321_v61 = vpop.f32.mrb[8].mxu0  ;;  %1337 = vmatpush1.bf16.msra.mxu1 %v1811_v31 }
 0x150   :  { %v312_v62 = vpop.f32.mrb[9].mxu0  ;;  %1330 = vmatprep.subr.bf16.mxu1 %v1814_v32 }
 0x151   :  { %v1322_v63 = vpop.f32.mrb[10].mxu0 }
 0x152   :  { %v399_v0 = vpack.c.bf16 %v1322_v63, %v1321_v61  ;;  %v315_v1 = vpop.f32.mrb[11].mxu0 }
 0x153   :  { %v398_v2 = vpack.c.bf16 %v315_v1, %v312_v62  ;;  %1338 = vmatpush1.bf16.msra.mxu1 %v1817_v34 }
 0x154   :  { %1331 = vmatprep.subr.bf16.mxu1 %v1820_v35 }
 0x155   :  { %669 = vmatmul.mubr.bf16.gmra.mrb[8].mxu1 %v396_v60  ;;  %782 = vmatmul.mubr.bf16.gmra.mrb[24].mxu0 %v396_v60 }
 0x156   :  { %678 = vmatprep.mubr.bf16.mxu1 %v1707_v48  ;;  %791 = vmatprep.mubr.bf16.mxu0 %v1707_v48 }
 0x157   :  { %v1325_v3 = vpop.f32.mrb[12].mxu0  ;;  %1339 = vmatpush1.bf16.msra.mxu1 %v1823_v38 }
 0x158   :  { %v328_v4 = vpop.f32.mrb[13].mxu0  ;;  %1332 = vmatprep.subr.bf16.mxu1 %v1826_v39 }
 0x159   :  { %v1326_v5 = vpop.f32.mrb[14].mxu0 }
 0x15a   :  { %v401_v6 = vpack.c.bf16 %v1326_v5, %v1325_v3  ;;  %v331_v7 = vpop.f32.mrb[15].mxu0  ;;  %v446_v3 = vsub.s32 2, %v1877_v10 }
 0x15b   :  { %v400_v8 = vpack.c.bf16 %v331_v7, %v328_v4  ;;  %1340 = vmatpush1.bf16.msra.mxu1 %v1829_v40 }
 0x15c   :  { %1333 = vmatprep.subr.bf16.mxu1 %v1832_v41  ;;  %v1934_v13 = vrot.slane %v1883_v12, %v446_v3 }
 0x15d   :  { %679 = vmatmul.mubr.bf16.gmra.mrb[12].mxu1 %v397_v58  ;;  %792 = vmatmul.mubr.bf16.gmra.mrb[28].mxu0 %v397_v58 }
 0x15e   :  { %688 = vmatprep.mubr.bf16.mxu1 %v1707_v48  ;;  %801 = vmatprep.mubr.bf16.mxu0 %v1707_v48 }
 0x15f   :  { %1341 = vmatpush1.bf16.msra.mxu1 %v1835_v43 }
 0x160   :  { %1334 = vmatprep.subr.bf16.mxu1 %v1839_v45 }
 0x163   :  { %1342 = vmatpush1.bf16.msra.mxu1 %v1841_v46 }
 0x165   :  { %689 = vmatmul.mubr.bf16.gmra.mrb[16].mxu1 %v398_v2  ;;  %802 = vmatmul.mubr.bf16.gmra.mrb[32].mxu0 %v398_v2 }
 0x166   :  { %698 = vmatprep.mubr.bf16.mxu1 %v1707_v48  ;;  %811 = vmatprep.mubr.bf16.mxu0 %v1707_v48 }
 0x16d   :  { %699 = vmatmul.mubr.bf16.gmra.mrb[20].mxu1 %v399_v0  ;;  %812 = vmatmul.mubr.bf16.gmra.mrb[36].mxu0 %v399_v0 }
 0x16e   :  { %708 = vmatprep.mubr.bf16.mxu1 %v1707_v48 }
 0x175   :  { %709 = vmatmul.mubr.bf16.gmra.mrb[24].mxu1 %v400_v8 }
 0x176   :  { %718 = vmatprep.mubr.bf16.mxu1 %v1707_v48 }
 0x17d   :  { %719 = vmatmul.mubr.bf16.gmra.mrb[28].mxu1 %v401_v6 }
 0x17e   :  { %821 = vmatprep.mubr.bf16.mxu1 %v1707_v48 }
 0x185   :  { %822 = vmatmul.mubr.bf16.vlgmr.msra.gmra.mrb[32].mxu1 %v400_v8 }
 0x186   :  { %831 = vmatprep.mubr.bf16.mxu1 %v1707_v48 }
 0x18d   :  { %832 = vmatmul.mubr.bf16.gmra.mrb[36].mxu1 %v401_v6 }
 0x218   :  { %v650_v16 = vpop.f32.mrb[0].mxu1  ;;  %v1892_v17 = vpop.f32.mrb[16].mxu0 }
 0x219   :  { %v651_v18 = vadd.f32 %v650_v16, %v1887_v14  ;;  %v652_v19 = vpop.f32.mrb[1].mxu1  ;;  %v1895_v20 = vpop.f32.mrb[17].mxu0 }
 0x21a   :  { %v653_v21 = vadd.f32 %v652_v19, %v1890_v15  ;;  %v654_v22 = vpop.f32.mrb[2].mxu1  ;;  %v1898_v23 = vpop.f32.mrb[18].mxu0 }
 0x21b   :  { %v1247_v24 = vmul.f32 -1.442695, %v651_v18  ;;  %v655_v25 = vadd.f32 %v654_v22, %v1887_v14  ;;  %v656_v26 = vpop.f32.mrb[3].mxu1  ;;  %v1901_v27 = vpop.f32.mrb[19].mxu0 }
 0x21c   :  { %v1263_v28 = vmul.f32 -1.442695, %v653_v21  ;;  %v657_v29 = vadd.f32 %v656_v26, %v1890_v15 }
 0x21d   :  { %1419 = vpow2.f32 %v1247_v24  ;;  %v1248_v30 = vmul.f32 -1.442695, %v655_v25 }
 0x21e   :  { %1421 = vpow2.f32 %v1263_v28  ;;  %v1264_v31 = vmul.f32 -1.442695, %v657_v29 }
 0x21f   :  { %1423 = vpow2.f32 %v1248_v30 }
 0x220   :  { %v660_v32 = vpop.f32.mrb[4].mxu1  ;;  %v1904_v33 = vpop.f32.mrb[20].mxu0  ;;  %1425 = vpow2.f32 %v1264_v31  ;;  %v766_v31 = vadd.f32 %v1895_v20, %v1931_v9 }
 0x221   :  { %v661_v34 = vadd.f32 %v660_v32, %v1887_v14  ;;  %v662_v35 = vpop.f32.mrb[5].mxu1  ;;  %v1907_v36 = vpop.f32.mrb[21].mxu0 }
 0x222   :  { %v663_v37 = vadd.f32 %v662_v35, %v1890_v15  ;;  %v664_v38 = vpop.f32.mrb[6].mxu1  ;;  %v1910_v39 = vpop.f32.mrb[22].mxu0  ;;  %v776_v3 = vadd.f32 %v1907_v36, %v1931_v9 }
 0x223   :  { %v1249_v40 = vmul.f32 -1.442695, %v661_v34  ;;  %v665_v41 = vadd.f32 %v664_v38, %v1887_v14  ;;  %v666_v42 = vpop.f32.mrb[7].mxu1  ;;  %v1913_v43 = vpop.f32.mrb[23].mxu0  ;;  %v778_v36 = vadd.f32 %v1910_v39, %v1934_v13 }
 0x224   :  { %v667_v44 = vadd.f32 %v666_v42, %v1890_v15  ;;  %v1265_v45 = vmul.f32 -1.442695, %v663_v37 }
 0x225   :  { %1427 = vpow2.f32 %v1249_v40  ;;  %v1250_v46 = vmul.f32 -1.442695, %v665_v41  ;;  %v764_v40 = vadd.f32 %v1892_v17, %v1934_v13 }
 0x226   :  { %v1266_v48 = vmul.f32 -1.442695, %v667_v44 }
 0x227   :  { %v1420_v47 = vpop.eup %1419  ;;  %1429 = vpow2.f32 %v1250_v46 }
 0x228   :  { %v1422_v49 = vpop.eup %1421  ;;  %v890_v50 = vadd.f32 1.0, %v1420_v47  ;;  %v670_v51 = vpop.f32.mrb[8].mxu1  ;;  %1431 = vpow2.f32 %v1265_v45  ;;  %v770_v45 = vadd.f32 %v1901_v27, %v1931_v9  ;;  %v768_v47 = vadd.f32 %v1898_v23, %v1934_v13 }
 0x229   :  { %v1916_v52 = vpop.f32.mrb[24].mxu0  ;;  %v1424_v53 = vpop.eup %1423  ;;  %v671_v54 = vadd.f32 %v670_v51, %v1887_v14  ;;  %v986_v62 = vadd.f32 1.0, %v1422_v49 }
 0x22a   :  { %v672_v55 = vpop.f32.mrb[9].mxu1  ;;  %v1919_v56 = vpop.f32.mrb[25].mxu0  ;;  %1433 = vrcp.f32 %v890_v50  ;;  %v891_v58 = vadd.f32 1.0, %v1424_v53 }
 0x22b   :  { %v673_v59 = vadd.f32 %v672_v55, %v1890_v15  ;;  %v674_v60 = vpop.f32.mrb[10].mxu1  ;;  %v1923_v61 = vpop.f32.mrb[26].mxu0  ;;  %1435 = vpow2.f32 %v1266_v48  ;;  %v1251_v63 = vmul.f32 -1.442695, %v671_v54 }
 0x22c   :  { %v675_v0 = vadd.f32 %v674_v60, %v1887_v14  ;;  %v676_v1 = vpop.f32.mrb[11].mxu1  ;;  %v1926_v2 = vpop.f32.mrb[27].mxu0  ;;  %1437 = vrcp.f32 %v891_v58 }
 0x22d   :  { %v677_v4 = vadd.f32 %v676_v1, %v1890_v15  ;;  %v1267_v5 = vmul.f32 -1.442695, %v673_v59  ;;  %v1426_v7 = vpop.eup %1425  ;;  %1439 = vpow2.f32 %v1251_v63 }
 0x22e   :  { %v1252_v6 = vmul.f32 -1.442695, %v675_v0  ;;  %1441 = vrcp.f32 %v986_v62  ;;  %v987_v21 = vadd.f32 1.0, %v1426_v7 }
 0x22f   :  { %v1428_v8 = vpop.eup %1427  ;;  %v1268_v11 = vmul.f32 -1.442695, %v677_v4 }
 0x230   :  { %v892_v16 = vadd.f32 1.0, %v1428_v8  ;;  %1443 = vpow2.f32 %v1252_v6  ;;  %v680_v18 = vpop.f32.mrb[12].mxu1  ;;  %v1936_v10 = vpop.f32.mrb[28].mxu0 }
 0x231   :  { %v1430_v19 = vpop.eup %1429  ;;  %1445 = vpow2.f32 %v1267_v5  ;;  %v681_v22 = vadd.f32 %v680_v18, %v1887_v14  ;;  %v682_v24 = vpop.f32.mrb[13].mxu1  ;;  %v774_v18 = vadd.f32 %v1904_v33, %v1934_v13  ;;  %v784_v33 = vadd.f32 %v1916_v52, %v1934_v13 }
 0x232   :  { %v1939_v25 = vpop.f32.mrb[29].mxu0  ;;  %1447 = vrcp.f32 %v892_v16  ;;  %v893_v26 = vadd.f32 1.0, %v1430_v19  ;;  %v683_v28 = vadd.f32 %v682_v24, %v1890_v15  ;;  %v684_v29 = vpop.f32.mrb[14].mxu1 }
 0x233   :  { %v1942_v12 = vpop.f32.mrb[30].mxu0  ;;  %v1432_v30 = vpop.eup %1431  ;;  %1449 = vpow2.f32 %v1268_v11  ;;  %v1253_v32 = vmul.f32 -1.442695, %v681_v22  ;;  %v685_v34 = vadd.f32 %v684_v29, %v1887_v14 }
 0x234   :  { %v686_v35 = vpop.f32.mrb[15].mxu1  ;;  %v1947_v37 = vpop.f32.mrb[31].mxu0  ;;  %1451 = vrcp.f32 %v893_v26  ;;  %v1269_v41 = vmul.f32 -1.442695, %v683_v28  ;;  %v988_v48 = vadd.f32 1.0, %v1432_v30  ;;  %v1114_v28 = vld [vmem:[#allocation8] sm:$0xff] }
 0x235   :  { %v1434_v38 = vpop.eup %1433  ;;  %1453 = vrcp.f32 %v987_v21  ;;  %v1254_v20 = vmul.f32 -1.442695, %v685_v34  ;;  %v687_v17 = vadd.f32 %v686_v35, %v1890_v15  ;;  %v780_v21 = vadd.f32 %v1913_v43, %v1931_v9 }
 0x236   :  { %v1436_v42 = vpop.eup %1435  ;;  %v1034_v44 = vmul.f32 %v1434_v38, %v766_v31  ;;  %1455 = vpow2.f32 %v1253_v32  ;;  %v786_v43 = vadd.f32 %v1919_v56, %v1931_v9  ;;  %v1115_v56 = vld [vmem:[#allocation8 + $0x8] sm:$0xff] }
 0x237   :  { %v1438_v46 = vpop.eup %1437  ;;  %1457 = vpow2.f32 %v1269_v41  ;;  %v989_v53 = vadd.f32 1.0, %v1436_v42  ;;  %v1270_v5 = vmul.f32 -1.442695, %v687_v17 }
 0x238   :  { %v1050_v49 = vadd.f32 %v1034_v44, %v764_v40  ;;  %v1035_v50 = vmul.f32 %v1438_v46, %v770_v45  ;;  %v1440_v51 = vpop.eup %1439  ;;  %1459 = vpow2.f32 %v1254_v20  ;;  %v690_v54 = vpop.f32.mrb[16].mxu1 }
 0x239   :  { %v1956_v55 = vpop.f32.mrb[32].mxu0  ;;  %v1958_v57 = vpop.eup %1441  ;;  %v894_v58 = vadd.f32 1.0, %v1440_v51  ;;  %v691_v23 = vadd.f32 %v690_v54, %v1887_v14 }
 0x23a   :  { %1461 = vtanh.f32 %v1050_v49  ;;  %v1051_v27 = vadd.f32 %v1035_v50, %v768_v47  ;;  %v692_v59 = vpop.f32.mrb[17].mxu1  ;;  %v1961_v60 = vpop.f32.mrb[33].mxu0  ;;  %v1082_v52 = vsub.f32 1.0, %v1958_v57  ;;  %v1130_v46 = vmul.f32 %v1958_v57, %v1114_v28 }
 0x23b   :  { %v1444_v62 = vpop.eup %1443  ;;  %1463 = vrcp.f32 %v988_v48  ;;  %v694_v63 = vpop.f32.mrb[18].mxu1  ;;  %v1255_v11 = vmul.f32 -1.442695, %v691_v23  ;;  %v693_v31 = vadd.f32 %v692_v59, %v1890_v15 }
 0x23c   :  { %v1963_v0 = vpop.f32.mrb[34].mxu0  ;;  %v1446_v1 = vpop.eup %1445  ;;  %1465 = vtanh.f32 %v1051_v27  ;;  %v895_v4 = vadd.f32 1.0, %v1444_v62  ;;  %v695_v34 = vadd.f32 %v694_v63, %v1887_v14 }
 0x23d   :  { %v696_v6 = vpop.f32.mrb[19].mxu1  ;;  %v1967_v7 = vpop.f32.mrb[35].mxu0  ;;  %1467 = vrcp.f32 %v894_v58  ;;  %v990_v24 = vadd.f32 1.0, %v1446_v1  ;;  %v788_v1 = vadd.f32 %v1923_v61, %v1934_v13 }
 0x23e   :  { %v1448_v8 = vpop.eup %1447  ;;  %1469 = vrcp.f32 %v989_v53  ;;  %v1271_v53 = vmul.f32 -1.442695, %v693_v31  ;;  %v1256_v59 = vmul.f32 -1.442695, %v695_v34  ;;  %v697_v57 = vadd.f32 %v696_v6, %v1890_v15 }
 0x23f   :  { %v1450_v16 = vpop.eup %1449  ;;  %v1036_v19 = vmul.f32 %v1448_v8, %v776_v3  ;;  %1471 = vrcp.f32 %v895_v4 }
 0x240   :  { %v1452_v22 = vpop.eup %1451  ;;  %1473 = vpow2.f32 %v1270_v5  ;;  %v700_v39 = vpop.f32.mrb[20].mxu1  ;;  %v991_v41 = vadd.f32 1.0, %v1450_v16  ;;  %v1272_v61 = vmul.f32 -1.442695, %v697_v57 }
 0x241   :  { %v1454_v26 = vpop.eup %1453  ;;  %v1052_v29 = vadd.f32 %v1036_v19, %v774_v18  ;;  %v1037_v30 = vmul.f32 %v1452_v22, %v780_v21  ;;  %1475 = vpow2.f32 %v1255_v11  ;;  %v1981_v35 = vpop.f32.mrb[36].mxu0  ;;  %v701_v47 = vadd.f32 %v700_v39, %v1887_v14  ;;  %v1116_v18 = vld [vmem:[#allocation8 + $0x10] sm:$0xff]  ;;  %v1117_v39 = vld [vmem:[#allocation8 + $0x18] sm:$0xff] }
 0x242   :  { %v1456_v32 = vpop.eup %1455  ;;  %v702_v44 = vpop.f32.mrb[21].mxu1  ;;  %v1083_v17 = vsub.f32 1.0, %v1454_v26  ;;  %v1131_v63 = vmul.f32 %v1454_v26, %v1115_v56  ;;  %v790_v21 = vadd.f32 %v1926_v2, %v1931_v9 }
 0x243   :  { %v1458_v38 = vpop.eup %1457  ;;  %1477 = vtanh.f32 %v1052_v29  ;;  %v1053_v40 = vadd.f32 %v1037_v30, %v778_v36  ;;  %v896_v42 = vadd.f32 1.0, %v1456_v32  ;;  %v1983_v45 = vpop.f32.mrb[37].mxu0  ;;  %v1257_v11 = vmul.f32 -1.442695, %v701_v47 }
 0x244   :  { %v1460_v20 = vpop.eup %1459  ;;  %1479 = vrcp.f32 %v990_v24  ;;  %v704_v48 = vpop.f32.mrb[22].mxu1  ;;  %v992_v3 = vadd.f32 1.0, %v1458_v38  ;;  %v703_v6 = vadd.f32 %v702_v44, %v1890_v15 }
 0x245   :  { %v1988_v49 = vpop.f32.mrb[38].mxu0  ;;  %v1462_v50 = vpop.eup %1461  ;;  %1481 = vtanh.f32 %v1053_v40  ;;  %v897_v51 = vadd.f32 1.0, %v1460_v20  ;;  %v705_v24 = vadd.f32 %v704_v48, %v1887_v14 }
 0x246   :  { %v706_v54 = vpop.f32.mrb[23].mxu1  ;;  %v1990_v27 = vpop.f32.mrb[39].mxu0  ;;  %v1098_v23 = vmul.f32 %v1462_v50, %v1082_v52  ;;  %1483 = vrcp.f32 %v896_v42  ;;  %v1273_v20 = vmul.f32 -1.442695, %v703_v6 }
 0x247   :  { %v1464_v58 = vpop.eup %1463  ;;  %1485 = vrcp.f32 %v991_v41  ;;  %v1258_v56 = vmul.f32 -1.442695, %v705_v24  ;;  %v707_v47 = vadd.f32 %v706_v54, %v1890_v15  ;;  %v800_v54 = vadd.f32 %v1947_v37, %v1931_v9 }
 0x248   :  { %v1466_v62 = vpop.eup %1465  ;;  %v1146_v5 = vadd.f32 %v1130_v46, %v1098_v23  ;;  %1487 = vrcp.f32 %v897_v51  ;;  %v710_v26 = vpop.f32.mrb[24].mxu1  ;;  %v1084_v29 = vsub.f32 1.0, %v1464_v58  ;;  %v1132_v2 = vmul.f32 %v1464_v58, %v1116_v18 }
 0x249   :  { %v1468_v4 = vpop.eup %1467  ;;  %v1099_v8 = vmul.f32 %v1466_v62, %v1083_v17  ;;  %1489 = vpow2.f32 %v1271_v53  ;;  %v712_v32 = vpop.f32.mrb[25].mxu1  ;;  %v711_v38 = vadd.f32 %v710_v26, %v1887_v14  ;;  %v796_v17 = vadd.f32 %v1939_v25, %v1931_v9 }
 0x24a   :  { %v1470_v16 = vpop.eup %1469  ;;  %v1038_v19 = vmul.f32 %v1468_v4, %v786_v43  ;;  %1162 = vst [vmem:[#allocation11] sm:$0xff] %v1146_v5  ;;  %1491 = vpow2.f32 %v1256_v59  ;;  %v714_v40 = vpop.f32.mrb[26].mxu1  ;;  %v794_v62 = vadd.f32 %v1936_v10, %v1934_v13  ;;  %v798_v25 = vadd.f32 %v1942_v12, %v1934_v13 }
 0x24b   :  { %v1472_v22 = vpop.eup %1471  ;;  %v1147_v36 = vadd.f32 %v1131_v63, %v1099_v8  ;;  %1493 = vrcp.f32 %v992_v3  ;;  %v1085_v34 = vsub.f32 1.0, %v1470_v16  ;;  %v2000_v52 = vpop.f32.mrb[27].mxu1  ;;  %v1133_v50 = vmul.f32 %v1470_v16, %v1117_v39 }
 0x24c   :  { %v1474_v28 = vpop.eup %1473  ;;  %v1054_v30 = vadd.f32 %v1038_v19, %v784_v33  ;;  %v1039_v31 = vmul.f32 %v1472_v22, %v790_v21  ;;  %1495 = vpow2.f32 %v1257_v11  ;;  %v1259_v59 = vmul.f32 -1.442695, %v711_v38  ;;  %v1118_v11 = vld [vmem:[#allocation8 + $0x20] sm:$0xff] }
 0x24d   :  { %v1476_v43 = vpop.eup %1475  ;;  %1163 = vst [vmem:[#allocation11 + $0x8] sm:$0xff] %v1147_v36  ;;  %v993_v51 = vadd.f32 1.0, %v1474_v28  ;;  %v1274_v4 = vmul.f32 -1.442695, %v707_v47  ;;  %v715_v37 = vadd.f32 %v714_v40, %v1887_v14  ;;  %v713_v24 = vadd.f32 %v712_v32, %v1890_v15 }
 0x24e   :  { %v1478_v41 = vpop.eup %1477  ;;  %1497 = vtanh.f32 %v1054_v30  ;;  %v1055_v42 = vadd.f32 %v1039_v31, %v788_v1  ;;  %v898_v44 = vadd.f32 1.0, %v1476_v43  ;;  %v1119_v31 = vld [vmem:[#allocation8 + $0x28] sm:$0xff] }
 0x24f   :  { %v1480_v33 = vpop.eup %1479  ;;  %v1100_v46 = vmul.f32 %v1478_v41, %v1084_v29  ;;  %1499 = vpow2.f32 %v1272_v61  ;;  %v1260_v32 = vmul.f32 -1.442695, %v715_v37 }
 0x250   :  { %v1482_v48 = vpop.eup %1481  ;;  %1501 = vtanh.f32 %v1055_v42  ;;  %v720_v5 = vpop.f32.mrb[28].mxu1  ;;  %v1086_v29 = vsub.f32 1.0, %v1480_v33  ;;  %v1134_v30 = vmul.f32 %v1480_v33, %v1118_v11  ;;  %v806_v33 = vadd.f32 %v1961_v60, %v1931_v9 }
 0x251   :  { %v1484_v53 = vpop.eup %1483  ;;  %v1148_v58 = vadd.f32 %v1132_v2, %v1100_v46  ;;  %v1101_v23 = vmul.f32 %v1482_v48, %v1085_v34  ;;  %1503 = vrcp.f32 %v898_v44  ;;  %v721_v10 = vadd.f32 %v720_v5, %v1887_v14  ;;  %v722_v19 = vpop.f32.mrb[29].mxu1 }
 0x252   :  { %v1486_v57 = vpop.eup %1485  ;;  %v1040_v63 = vmul.f32 %v1484_v53, %v796_v17  ;;  %1505 = vpow2.f32 %v1273_v20  ;;  %v2014_v6 = vadd.f32 %v722_v19, %v1890_v15  ;;  %v724_v12 = vpop.f32.mrb[30].mxu1  ;;  %v1275_v46 = vmul.f32 -1.442695, %v713_v24 }
 0x253   :  { %v1488_v1 = vpop.eup %1487  ;;  %1164 = vst [vmem:[#allocation11 + $0x10] sm:$0xff] %v1148_v58  ;;  %v1149_v3 = vadd.f32 %v1133_v50, %v1101_v23  ;;  %1507 = vpow2.f32 %v1258_v56  ;;  %v726_v26 = vpop.f32.mrb[31].mxu1  ;;  %v725_v43 = vadd.f32 %v724_v12, %v1887_v14  ;;  %v1087_v42 = vsub.f32 1.0, %v1486_v57 }
 0x254   :  { %v1490_v8 = vpop.eup %1489  ;;  %v1056_v16 = vadd.f32 %v1040_v63, %v794_v62  ;;  %1509 = vrcp.f32 %v993_v51  ;;  %v1041_v18 = vmul.f32 %v1488_v1, %v800_v54  ;;  %v2021_v38 = vadd.f32 %v726_v26, %v1890_v15  ;;  %v1120_v63 = vld [vmem:[#allocation8 + $0x30] sm:$0xff] }
 0x255   :  { %v1492_v21 = vpop.eup %1491  ;;  %1165 = vst [vmem:[#allocation11 + $0x18] sm:$0xff] %v1149_v3  ;;  %1511 = vpow2.f32 %v1259_v59  ;;  %v994_v34 = vadd.f32 1.0, %v1490_v8  ;;  %v1135_v20 = vmul.f32 %v1486_v57, %v1119_v31  ;;  %v1261_v48 = vmul.f32 -1.442695, %v721_v10 }
 0x256   :  { %v2016_v22 = vpop.eup %1493  ;;  %1513 = vtanh.f32 %v1056_v16  ;;  %v1057_v36 = vadd.f32 %v1041_v18, %v798_v25  ;;  %v899_v61 = vadd.f32 1.0, %v1492_v21  ;;  %v804_v51 = vadd.f32 %v1956_v55, %v1934_v13 }
 0x257   :  { %v1496_v28 = vpop.eup %1495  ;;  %1515 = vpow2.f32 %v1274_v4  ;;  %v717_v58 = vadd.f32 %v2000_v52, %v1890_v15  ;;  %v1088_v15 = vsub.f32 1.0, %v2016_v22  ;;  %v1121_v52 = vld [vmem:[#allocation8 + $0x38] sm:$0xff]  ;;  %v1136_v18 = vmul.f32 %v2016_v22, %v1120_v63 }
 0x258   :  { %v1498_v2 = vpop.eup %1497  ;;  %1517 = vtanh.f32 %v1057_v36  ;;  %v900_v39 = vadd.f32 1.0, %v1496_v28  ;;  %v2025_v50 = vpop.f32.mrb[32].mxu1  ;;  %v810_v12 = vadd.f32 %v1967_v7, %v1931_v9  ;;  %v1262_v36 = vmul.f32 -1.442695, %v725_v43 }
 0x259   :  { %v1500_v40 = vpop.eup %1499  ;;  %v1102_v41 = vmul.f32 %v1498_v2, %v1086_v29  ;;  %1519 = vrcp.f32 %v899_v61  ;;  %v2031_v23 = vpop.f32.mrb[33].mxu1  ;;  %v1276_v11 = vmul.f32 -1.442695, %v717_v58  ;;  %v1277_v28 = vmul.f32 -1.442695, %v2014_v6 }
 0x25a   :  { %v1502_v44 = vpop.eup %1501  ;;  %1521 = vrcp.f32 %v900_v39  ;;  %v2033_v57 = vpop.f32.mrb[34].mxu1  ;;  %v995_v1 = vadd.f32 1.0, %v1500_v40  ;;  %v808_v22 = vadd.f32 %v1963_v0, %v1934_v13  ;;  %v816_v31 = vadd.f32 %v1983_v45, %v1931_v9 }
 0x25b   :  { %v1504_v56 = vpop.eup %1503  ;;  %v1150_v14 = vadd.f32 %v1134_v30, %v1102_v41  ;;  %v1103_v47 = vmul.f32 %v1502_v44, %v1087_v42  ;;  %1523 = vrcp.f32 %v994_v34  ;;  %v2035_v55 = vpop.f32.mrb[35].mxu1  ;;  %v814_v41 = vadd.f32 %v1981_v35, %v1934_v13  ;;  %v1122_v44 = vld [vmem:[#allocation8 + $0x40] sm:$0xff] }
 0x25c   :  { %v1506_v17 = vpop.eup %1505  ;;  %v1042_v53 = vmul.f32 %v1504_v56, %v806_v33  ;;  %1525 = vpow2.f32 %v1260_v32  ;;  %v820_v35 = vadd.f32 %v1990_v27, %v1931_v9 }
 0x25d   :  { %v1508_v60 = vpop.eup %1507  ;;  %1166 = vst [vmem:[#allocation11 + $0x20] sm:$0xff] %v1150_v14  ;;  %v1151_v59 = vadd.f32 %v1135_v20, %v1103_v47  ;;  %1527 = vpow2.f32 %v1275_v46  ;;  %v996_v5 = vadd.f32 1.0, %v1506_v17  ;;  %v1278_v46 = vmul.f32 -1.442695, %v2021_v38 }
 0x25e   :  { %v1510_v62 = vpop.eup %1509  ;;  %v1058_v54 = vadd.f32 %v1042_v53, %v804_v51  ;;  %v901_v3 = vadd.f32 1.0, %v1508_v60  ;;  %1529 = vpow2.f32 %v1261_v48  ;;  %v818_v60 = vadd.f32 %v1988_v49, %v1934_v13 }
 0x25f   :  { %v1512_v25 = vpop.eup %1511  ;;  %1167 = vst [vmem:[#allocation11 + $0x28] sm:$0xff] %v1151_v59  ;;  %v1089_v19 = vsub.f32 1.0, %v1510_v62  ;;  %v1137_v37 = vmul.f32 %v1510_v62, %v1121_v52  ;;  %v826_v38 = vadd.f32 %v2031_v23, %v1931_v9 }
 0x260   :  { %v1514_v4 = vpop.eup %1513  ;;  %1531 = vtanh.f32 %v1058_v54  ;;  %v902_v8 = vadd.f32 1.0, %v1512_v25  ;;  %v2042_v29 = vpop.f32.mrb[36].mxu1 }
 0x261   :  { %v1516_v16 = vpop.eup %1515  ;;  %v1104_v10 = vmul.f32 %v1514_v4, %v1088_v15  ;;  %1533 = vrcp.f32 %v901_v3  ;;  %v2048_v2 = vpop.f32.mrb[37].mxu1  ;;  %v824_v3 = vadd.f32 %v2025_v50, %v1934_v13  ;;  %v1123_v4 = vld [vmem:[#allocation8 + $0x48] sm:$0xff] }
 0x262   :  { %v1518_v21 = vpop.eup %1517  ;;  %1535 = vrcp.f32 %v995_v1  ;;  %v997_v34 = vadd.f32 1.0, %v1516_v16  ;;  %v2050_v39 = vpop.f32.mrb[38].mxu1  ;;  %v1124_v16 = vld [vmem:[#allocation8 + $0x50] sm:$0xff] }
 0x263   :  { %v1520_v61 = vpop.eup %1519  ;;  %v1152_v24 = vadd.f32 %v1136_v18, %v1104_v10  ;;  %v1105_v26 = vmul.f32 %v1518_v21, %v1089_v19  ;;  %1537 = vrcp.f32 %v902_v8  ;;  %v2054_v42 = vpop.f32.mrb[39].mxu1 }
 0x264   :  { %v1043_v30 = vmul.f32 %v1520_v61, %v810_v12  ;;  %1539 = vrcp.f32 %v996_v5  ;;  %v1522_v7 = vpop.eup %1521 }
 0x265   :  { %1168 = vst [vmem:[#allocation11 + $0x30] sm:$0xff] %v1152_v24  ;;  %v1153_v43 = vadd.f32 %v1137_v37, %v1105_v26  ;;  %1541 = vpow2.f32 %v1276_v11  ;;  %v1524_v6 = vpop.eup %1523  ;;  %v1044_v0 = vmul.f32 %v1522_v7, %v816_v31  ;;  %v836_v7 = vadd.f32 %v2048_v2, %v1931_v9 }
 0x266   :  { %v1059_v40 = vadd.f32 %v1043_v30, %v808_v22  ;;  %1543 = vpow2.f32 %v1262_v36  ;;  %v1526_v32 = vpop.eup %1525  ;;  %v1090_v14 = vsub.f32 1.0, %v1524_v6  ;;  %v1138_v51 = vmul.f32 %v1524_v6, %v1122_v44  ;;  %v1125_v6 = vld [vmem:[#allocation8 + $0x58] sm:$0xff] }
 0x267   :  { %1169 = vst [vmem:[#allocation11 + $0x38] sm:$0xff] %v1153_v43  ;;  %1545 = vpow2.f32 %v1277_v28  ;;  %v1528_v45 = vpop.eup %1527  ;;  %v1060_v20 = vadd.f32 %v1044_v0, %v814_v41  ;;  %v903_v33 = vadd.f32 1.0, %v1526_v32  ;;  %v830_v36 = vadd.f32 %v2035_v55, %v1931_v9 }
 0x268   :  { %1547 = vtanh.f32 %v1059_v40  ;;  %v1530_v56 = vpop.eup %1529  ;;  %v998_v54 = vadd.f32 1.0, %v1528_v45  ;;  %v828_v30 = vadd.f32 %v2033_v57, %v1934_v13  ;;  %v834_v40 = vadd.f32 %v2042_v29, %v1934_v13 }
 0x269   :  { %1549 = vrcp.f32 %v997_v34  ;;  %v904_v48 = vadd.f32 1.0, %v1530_v56  ;;  %v840_v2 = vadd.f32 %v2054_v42, %v1931_v9  ;;  %v838_v29 = vadd.f32 %v2050_v39, %v1934_v13 }
 0x26a   :  { %v1532_v47 = vpop.eup %1531  ;;  %1551 = vtanh.f32 %v1060_v20 }
 0x26b   :  { %v1534_v17 = vpop.eup %1533  ;;  %v1106_v53 = vmul.f32 %v1532_v47, %v1090_v14  ;;  %1553 = vrcp.f32 %v903_v33  ;;  %v1126_v14 = vld [vmem:[#allocation8 + $0x60] sm:$0xff] }
 0x26c   :  { %v1536_v58 = vpop.eup %1535  ;;  %v1045_v59 = vmul.f32 %v1534_v17, %v820_v35  ;;  %1555 = vpow2.f32 %v1278_v46 }
 0x26d   :  { %v1538_v62 = vpop.eup %1537  ;;  %v1154_v63 = vadd.f32 %v1138_v51, %v1106_v53  ;;  %1557 = vrcp.f32 %v904_v48  ;;  %v1091_v8 = vsub.f32 1.0, %v1536_v58  ;;  %v1139_v19 = vmul.f32 %v1536_v58, %v1123_v4 }
 0x26e   :  { %v1540_v1 = vpop.eup %1539  ;;  %v1061_v27 = vadd.f32 %v1045_v59, %v818_v60  ;;  %v1046_v25 = vmul.f32 %v1538_v62, %v826_v38  ;;  %v1127_v59 = vld [vmem:[#allocation8 + $0x68] sm:$0xff]  ;;  %v1128_v62 = vld [vmem:[#allocation8 + $0x70] sm:$0xff] }
 0x26f   :  { %v1542_v15 = vpop.eup %1541  ;;  %1170 = vst [vmem:[#allocation11 + $0x40] sm:$0xff] %v1154_v63  ;;  %v1092_v37 = vsub.f32 1.0, %v1540_v1  ;;  %v1140_v26 = vmul.f32 %v1540_v1, %v1124_v16 }
 0x270   :  { %v1544_v52 = vpop.eup %1543  ;;  %1559 = vtanh.f32 %v1061_v27  ;;  %v1062_v49 = vadd.f32 %v1046_v25, %v824_v3  ;;  %v999_v18 = vadd.f32 1.0, %v1542_v15 }
 0x271   :  { %v1546_v5 = vpop.eup %1545  ;;  %1561 = vrcp.f32 %v998_v54  ;;  %v905_v23 = vadd.f32 1.0, %v1544_v52  ;;  %v1129_v52 = vld [vmem:[#allocation8 + $0x78] sm:$0xff] }
 0x272   :  { %v1548_v11 = vpop.eup %1547  ;;  %v1000_v12 = vadd.f32 1.0, %v1546_v5 }
 0x273   :  { %v1550_v10 = vpop.eup %1549  ;;  %v1107_v21 = vmul.f32 %v1548_v11, %v1091_v8  ;;  %1563 = vrcp.f32 %v905_v23 }
 0x274   :  { %v1552_v50 = vpop.eup %1551  ;;  %1565 = vtanh.f32 %v1062_v49  ;;  %v1093_v0 = vsub.f32 1.0, %v1550_v10  ;;  %v1141_v20 = vmul.f32 %v1550_v10, %v1125_v6 }
 0x275   :  { %v1554_v61 = vpop.eup %1553  ;;  %v1155_v24 = vadd.f32 %v1139_v19, %v1107_v21  ;;  %v1108_v28 = vmul.f32 %v1552_v50, %v1092_v37  ;;  %1567 = vrcp.f32 %v999_v18 }
 0x276   :  { %v1556_v22 = vpop.eup %1555  ;;  %v1047_v31 = vmul.f32 %v1554_v61, %v830_v36  ;;  %1569 = vrcp.f32 %v1000_v12 }
 0x277   :  { %v1558_v43 = vpop.eup %1557  ;;  %1171 = vst [vmem:[#allocation11 + $0x48] sm:$0xff] %v1155_v24  ;;  %v1156_v34 = vadd.f32 %v1140_v26, %v1108_v28  ;;  %v1001_v45 = vadd.f32 1.0, %v1556_v22 }
 0x278   :  { %v1063_v55 = vadd.f32 %v1047_v31, %v828_v30  ;;  %v1048_v41 = vmul.f32 %v1558_v43, %v836_v7 }
 0x279   :  { %1172 = vst [vmem:[#allocation11 + $0x50] sm:$0xff] %v1156_v34 }
 0x27a   :  { %v1560_v32 = vpop.eup %1559  ;;  %1571 = vtanh.f32 %v1063_v55  ;;  %v1064_v57 = vadd.f32 %v1048_v41, %v834_v40 }
 0x27b   :  { %v1562_v44 = vpop.eup %1561  ;;  %v1109_v33 = vmul.f32 %v1560_v32, %v1093_v0 }
 0x27c   :  { %1573 = vtanh.f32 %v1064_v57  ;;  %v1094_v47 = vsub.f32 1.0, %v1562_v44  ;;  %v1142_v51 = vmul.f32 %v1562_v44, %v1126_v14 }
 0x27d   :  { %v1564_v46 = vpop.eup %1563  ;;  %v1157_v56 = vadd.f32 %v1141_v20, %v1109_v33  ;;  %1575 = vrcp.f32 %v1001_v45 }
 0x27e   :  { %v1049_v35 = vmul.f32 %v1564_v46, %v840_v2  ;;  %v1566_v48 = vpop.eup %1565 }
 0x27f   :  { %1173 = vst [vmem:[#allocation11 + $0x58] sm:$0xff] %v1157_v56  ;;  %v1568_v17 = vpop.eup %1567  ;;  %v1110_v53 = vmul.f32 %v1566_v48, %v1094_v47 }
 0x280   :  { %v1065_v58 = vadd.f32 %v1049_v35, %v838_v29  ;;  %v1570_v60 = vpop.eup %1569  ;;  %v1095_v9 = vsub.f32 1.0, %v1568_v17  ;;  %v1143_v63 = vmul.f32 %v1568_v17, %v1127_v59 }
 0x281   :  { %v1158_v38 = vadd.f32 %v1142_v51, %v1110_v53  ;;  %v1096_v54 = vsub.f32 1.0, %v1570_v60  ;;  %v1144_v13 = vmul.f32 %v1570_v60, %v1128_v62 }
 0x282   :  { %1577 = vtanh.f32 %v1065_v58 }
 0x283   :  { %1174 = vst [vmem:[#allocation11 + $0x60] sm:$0xff] %v1158_v38 }
 0x284   :  { %v1572_v42 = vpop.eup %1571 }
 0x285   :  { %v1111_v1 = vmul.f32 %v1572_v42, %v1095_v9 }
 0x286   :  { %v1574_v27 = vpop.eup %1573 }
 0x287   :  { %v1159_v39 = vadd.f32 %v1143_v63, %v1111_v1  ;;  %v1112_v3 = vmul.f32 %v1574_v27, %v1096_v54  ;;  %v1576_v25 = vpop.eup %1575 }
 0x288   :  { %v1097_v4 = vsub.f32 1.0, %v1576_v25  ;;  %v1145_v5 = vmul.f32 %v1576_v25, %v1129_v52 }
 0x289   :  { %1175 = vst [vmem:[#allocation11 + $0x68] sm:$0xff] %v1159_v39  ;;  %v1160_v15 = vadd.f32 %v1144_v13, %v1112_v3 }
 0x28b   :  { %1176 = vst [vmem:[#allocation11 + $0x70] sm:$0xff] %v1160_v15 }
 0x28c   :  { %v1578_v49 = vpop.eup %1577 }
 0x28d   :  { %v1113_v8 = vmul.f32 %v1578_v49, %v1097_v4 }
 0x28f   :  { %v1161_v23 = vadd.f32 %v1145_v5, %v1113_v8 }
 0x291   :  { %1177 = vst [vmem:[#allocation11 + $0x78] sm:$0xff] %v1161_v23 }
 0x292   :  { %1678 = shalt.err (!%p1675_p8)
}
 0x293   :  { %s1679_s24 = scalar_lea.hbm %s2097_s5, 2048 }
 0x294   :  { %p1680_p9 = scmp.ne.s32.totalorder %s2097_s5, %s1679_s24  ;;  %p1683_p10 = scmp.lt.u32.totalorder %s1679_s24, %s2097_s5 }
 0x296   :  { %p1685_p11 = pnand %p1683_p10, %p1680_p9 }
 0x298   :  { %1688 = shalt.err (!%p1685_p11)
}
 0x299   :  { %1189 = dma.vmem_to_hbm [thread:$0]  %s1184_s19, 2048, %s2097_s5, [#allocation5], %s1702_s0, %s1702_s0, %s1703_s21  }
 0x29a   :  { %1695 = dma.done.wait [#allocation5], 2048  }
 0x29b   :  { %1696 = vsyncadd [#allocation5], 4294965248 }
 0x29c   :  { %1193 = vsyncpa [#allocation4], 1 }
 0x29d   :  { %1194 = vsyncpa [#allocation7], 1 }
 0x29e   :  { %1195 = vsyncpa [#allocation10], 1 }
 0x29f   :  { %1196 = vsyncpa [#allocation5], 1 }

</bundles_post_ra>
